<compile_context>
chip_gen: v6e
topology: v6e:2x2x1
jax: 0.10.0
libtpu: 0.0.40
codegen_flags: <defaults>
</compile_context>

<pallas_src>
import functools

import jax
import jax.numpy as jnp
from jax.experimental import pallas as pl
from jax.experimental.pallas import tpu as pltpu


def _round_up(x, m):
    return ((x + m - 1) // m) * m


# ---------------------------------------------------------------------------
# Kernel 1: h1 = ReLU(x @ w1 + b1)
#   grid = (H1 blocks [parallel], K tiles [arbitrary/reduction])
# ---------------------------------------------------------------------------
def _fc1_kernel(x_ref, w1_ref, b1_ref, h1_ref, acc_ref):
    k = pl.program_id(1)

    @pl.when(k == 0)
    def _():
        acc_ref[...] = jnp.zeros_like(acc_ref)

    # (B, tk) @ (tk, th1) accumulated in f32 (bf16 operands on the MXU).
    acc_ref[...] += jnp.dot(x_ref[...], w1_ref[...],
                            preferred_element_type=jnp.float32)

    @pl.when(k == pl.num_programs(1) - 1)
    def _():
        h1_ref[...] = jnp.maximum(acc_ref[...] + b1_ref[...], 0.0)


# ---------------------------------------------------------------------------
# Kernel 2 (tiny epilogue): sigmoid(ReLU(h1 @ w2 + b2) @ wh + bh)
# ---------------------------------------------------------------------------
def _epilogue_kernel(h1_ref, w2_ref, b2_ref, wh_ref, bh_ref, out_ref):
    h2 = jnp.maximum(
        jnp.dot(h1_ref[...], w2_ref[...], preferred_element_type=jnp.float32)
        + b2_ref[...], 0.0)
    logits = jnp.dot(h2, wh_ref[...],
                     preferred_element_type=jnp.float32) + bh_ref[...]
    out_ref[...] = jax.nn.sigmoid(logits).astype(out_ref.dtype)


@functools.partial(jax.jit, static_argnames=("tk", "th1"))
def multi_head_binary_forward(x, w1, b1, w2, b2, wh, bh, *, tk=4096, th1=512):
    """x: (B, D) f32/bf16; w1: (D, H1_pad) streaming dtype (bf16); b1: (1, H1_pad) f32;
    w2: (H1_pad, H2) f32; b2: (1, H2); wh: (H2, L); bh: (1, L). Returns (B, L) f32."""
    B, D = x.shape
    Dw, H1p = w1.shape
    H2 = w2.shape[1]
    L = wh.shape[1]
    assert Dw == D

    # --- tiling ---
    tk = min(tk, D)
    assert D % tk == 0 and tk % 128 == 0, "input_dim must be a multiple of the K tile (tk % 128 == 0)"
    th1 = min(_round_up(th1, 128), H1p)
    assert H1p % th1 == 0 and th1 % 128 == 0

    stream_dtype = w1.dtype
    xs = x.astype(stream_dtype)
    itemsize = jnp.dtype(stream_dtype).itemsize

    nh = H1p // th1
    nk = D // tk

    # VMEM budget: double-buffered x/w1/b1/h1 tiles + f32 accumulator + headroom.
    vmem_bytes = (2 * (B * tk + tk * th1) * itemsize
                  + 2 * (th1 + B * th1) * 4
                  + B * th1 * 4
                  + (4 << 20))
    vmem_bytes = int(min(vmem_bytes, 128 << 20))

    cost = pl.CostEstimate(
        flops=2 * B * D * H1p,
        transcendentals=0,
        bytes_accessed=(D * H1p + B * D) * itemsize + (H1p + B * H1p + B * H1p) * 4,
    )

    h1 = pl.pallas_call(
        _fc1_kernel,
        out_shape=jax.ShapeDtypeStruct((B, H1p), jnp.float32),
        grid_spec=pltpu.PrefetchScalarGridSpec(
            num_scalar_prefetch=0,
            grid=(nh, nk),
            in_specs=[
                pl.BlockSpec((B, tk), lambda h, k: (0, k)),    # x tile along K
                # NOTE: add pipeline_mode=pl.Buffered(3) here if a profile at the
                # chosen tk shows exposed DMA and VMEM has headroom.
                pl.BlockSpec((tk, th1), lambda h, k: (k, h)),  # w1 tile (K, H1-block)
                pl.BlockSpec((1, th1), lambda h, k: (0, h)),   # b1 block (resident per h)
            ],
            out_specs=pl.BlockSpec((B, th1), lambda h, k: (0, h)),
            scratch_shapes=[pltpu.VMEM((B, th1), jnp.float32)],
        ),
        compiler_params=pltpu.CompilerParams(
            dimension_semantics=("parallel", "arbitrary"),
            vmem_limit_bytes=vmem_bytes),
        cost_estimate=cost,
    )(xs, w1, b1)

    out = pl.pallas_call(
        _epilogue_kernel,
        out_shape=jax.ShapeDtypeStruct((B, L), jnp.float32),
        grid_spec=pltpu.PrefetchScalarGridSpec(
            num_scalar_prefetch=0,
            grid=(1,),
            in_specs=[
                pl.BlockSpec((B, H1p), lambda i: (0, 0)),
                pl.BlockSpec((H1p, H2), lambda i: (0, 0)),
                pl.BlockSpec((1, H2), lambda i: (0, 0)),
                pl.BlockSpec((H2, L), lambda i: (0, 0)),
                pl.BlockSpec((1, L), lambda i: (0, 0)),
            ],
            out_specs=pl.BlockSpec((B, L), lambda i: (0, 0)),
        ),
        compiler_params=pltpu.CompilerParams(
            dimension_semantics=("arbitrary",)),
    )(h1, w2, b2, wh, bh)
    return out


# ---------------------------------------------------------------------------
# Parameter construction / preparation
# ---------------------------------------------------------------------------
def make_params(key, input_dim, hidden1, hidden2, n_heads):
    """PyTorch-Linear-style init U(-1/sqrt(fan_in), 1/sqrt(fan_in)).
    Weights are stored (in, out) == transpose of torch's (out, in)."""
    def linear(key, fan_in, fan_out):
        kw, kb = jax.random.split(key)
        bound = 1.0 / jnp.sqrt(fan_in)
        w = jax.random.uniform(kw, (fan_in, fan_out), jnp.float32, -bound, bound)
        b = jax.random.uniform(kb, (1, fan_out), jnp.float32, -bound, bound)
        return w, b

    k1, k2, k3 = jax.random.split(key, 3)
    w1, b1 = linear(k1, input_dim, hidden1)
    w2, b2 = linear(k2, hidden1, hidden2)

    head_keys = jax.random.split(k3, n_heads)
    ws, bs = [], []
    for hk in head_keys:
        w, b = linear(hk, hidden2, 1)
        ws.append(w)
        bs.append(b)
    wh = jnp.concatenate(ws, axis=1)   # (hidden2, l)
    bh = jnp.concatenate(bs, axis=1)   # (1, l)
    return w1, b1, w2, b2, wh, bh


def prepare_params(w1, b1, w2, b2, wh, bh, *, stream_dtype=jnp.bfloat16, th1=512):
    """Pad hidden1 to a lane-aligned multiple of the H1 block size (zero padding:
    b1 pad = 0 and padded w2 rows = 0, so ReLU(0) contributes nothing) and store
    the dominant fc1 weight in the HBM streaming dtype (bf16 halves the traffic)."""
    _, H1 = w1.shape
    th1 = min(_round_up(th1, 128), _round_up(H1, 128))
    H1p = _round_up(H1, th1)
    pad = H1p - H1
    w1p = jnp.pad(w1, ((0, 0), (0, pad))).astype(stream_dtype)
    b1p = jnp.pad(b1, ((0, 0), (0, pad))).astype(jnp.float32)
    w2p = jnp.pad(w2, ((0, pad), (0, 0))).astype(jnp.float32)
    return (w1p, b1p, w2p,
            b2.astype(jnp.float32), wh.astype(jnp.float32), bh.astype(jnp.float32))


if __name__ == "__main__":
    # Small shapes consistent with the module's forward (scaled down from
    # input_dim=393216, hidden1=1000, hidden2=10, l=37).  HIDDEN_1=120 deliberately
    # exercises the 128-lane padding path.
    BATCH = 8
    INPUT_DIM = 256
    HIDDEN_1 = 120
    HIDDEN_2 = 32
    L = 37

    key = jax.random.PRNGKey(0)
    kx, kp = jax.random.split(key)
    x = jax.random.normal(kx, (BATCH, INPUT_DIM), dtype=jnp.float32)
    raw = make_params(kp, INPUT_DIM, HIDDEN_1, HIDDEN_2, L)
    params = prepare_params(*raw)

    out_packed = multi_head_binary_forward(x, *params, tk=128)  # 2 K-steps at demo size
    out_packed = jax.block_until_ready(out_packed)

    # Forward returns a list of l tensors, each (batch, 1), like the PyTorch module.
    out_list = [out_packed[:, i:i + 1] for i in range(L)]
    assert len(out_list) == L and out_list[0].shape == (BATCH, 1)

    # Reference with the same dtype chain (bf16-stored x/w1, f32 math everywhere else).
    w1, b1, w2, b2, wh, bh = raw
    xs = x.astype(jnp.bfloat16).astype(jnp.float32)
    w1s = w1.astype(jnp.bfloat16).astype(jnp.float32)
    h1 = jnp.maximum(xs @ w1s + b1, 0.0)
    h2 = jnp.maximum(h1 @ w2 + b2, 0.0)
    ref = jax.nn.sigmoid(h2 @ wh + bh)
    assert jnp.allclose(out_packed, ref, atol=1e-4, rtol=1e-4), \
        float(jnp.max(jnp.abs(out_packed - ref)))

    # Loose sanity check against the pure-f32 PyTorch-equivalent reference
    # (bf16 weight storage introduces small, bounded deviations).
    h1f = jnp.maximum(x @ w1 + b1, 0.0)
    h2f = jnp.maximum(h1f @ w2 + b2, 0.0)
    ref_f32 = jax.nn.sigmoid(h2f @ wh + bh)
    assert jnp.allclose(out_packed, ref_f32, atol=3e-2), \
        float(jnp.max(jnp.abs(out_packed - ref_f32)))

    print("KERNEL_OK")
</pallas_src>

<mosaic_0001>
module attributes {stable_mosaic.version = 11 : i64} {
  func.func @_fc1_kernel(%arg0: i32, %arg1: i32, %arg2: memref<8x128xbf16, #tpu.memory_space<vmem>>, %arg3: memref<128x128xbf16, #tpu.memory_space<vmem>>, %arg4: memref<1x128xf32, #tpu.memory_space<vmem>>, %arg5: memref<8x128xf32, #tpu.memory_space<vmem>>, %arg6: memref<8x128xf32, #tpu.memory_space<vmem>>) attributes {dimension_semantics = [#tpu.dimension_semantics<parallel>, #tpu.dimension_semantics<arbitrary>], iteration_bounds = array<i64: 1, 2>, scalar_prefetch = 0 : i64, scratch_operands = 1 : i64, tpu.core_type = #tpu.core_type<tc>, window_params = [{transform_indices = @transform_0, window_bounds = array<i64: 8, 128>}, {transform_indices = @transform_1, window_bounds = array<i64: 128, 128>}, {transform_indices = @transform_2, window_bounds = array<i64: 1, 128>}, {transform_indices = @transform_3, window_bounds = array<i64: 8, 128>}]} {
    %c0_i32 = arith.constant 0 : i32
    %0 = arith.cmpi eq, %arg1, %c0_i32 : i32
    %1 = arith.extui %0 : i1 to i32
    %c0_i32_0 = arith.constant 0 : i32
    %2 = arith.cmpi ne, %1, %c0_i32_0 : i32
    scf.if %2 {
      %cst_9 = arith.constant 0.000000e+00 : f32
      %12 = vector.broadcast %cst_9 : f32 to vector<8x128xf32>
      %c0_10 = arith.constant 0 : index
      %c0_11 = arith.constant 0 : index
      %13 = vector.load %arg6[%c0_10, %c0_11] : memref<8x128xf32, #tpu.memory_space<vmem>>, vector<8x128xf32>
      tpu.vector_store %arg6[%c0_10, %c0_11], %12 {strides = array<i32>} : memref<8x128xf32, #tpu.memory_space<vmem>>, vector<8x128xf32>,
    } else {
    }
    %c0 = arith.constant 0 : index
    %c0_1 = arith.constant 0 : index
    %3 = vector.load %arg6[%c0, %c0_1] : memref<8x128xf32, #tpu.memory_space<vmem>>, vector<8x128xf32>
    %c0_2 = arith.constant 0 : index
    %c0_3 = arith.constant 0 : index
    %4 = vector.load %arg2[%c0_2, %c0_3] : memref<8x128xbf16, #tpu.memory_space<vmem>>, vector<8x128xbf16>
    %c0_4 = arith.constant 0 : index
    %c0_5 = arith.constant 0 : index
    %5 = vector.load %arg3[%c0_4, %c0_5] : memref<128x128xbf16, #tpu.memory_space<vmem>>, vector<128x128xbf16>
    %cst = arith.constant dense<0.000000e+00> : vector<8x128xf32>
    %6 = tpu.matmul %4, %5, %cst {dimension_numbers = #tpu.dot_dimension_numbers<[1], [0], [0], [1], [0, 0, 1, 1], [], []>} : vector<8x128xbf16>, vector<128x128xbf16>, vector<8x128xf32> -> vector<8x128xf32>
    %7 = arith.addf %3, %6 : vector<8x128xf32>
    %c0_6 = arith.constant 0 : index
    %c0_7 = arith.constant 0 : index
    %8 = vector.load %arg6[%c0_6, %c0_7] : memref<8x128xf32, #tpu.memory_space<vmem>>, vector<8x128xf32>
    tpu.vector_store %arg6[%c0_6, %c0_7], %7 {strides = array<i32>} : memref<8x128xf32, #tpu.memory_space<vmem>>, vector<8x128xf32>,
    %c1_i32 = arith.constant 1 : i32
    %9 = arith.cmpi eq, %arg1, %c1_i32 : i32
    %10 = arith.extui %9 : i1 to i32
    %c0_i32_8 = arith.constant 0 : i32
    %11 = arith.cmpi ne, %10, %c0_i32_8 : i32
    scf.if %11 {
      %c0_9 = arith.constant 0 : index
      %c0_10 = arith.constant 0 : index
      %12 = vector.load %arg6[%c0_9, %c0_10] : memref<8x128xf32, #tpu.memory_space<vmem>>, vector<8x128xf32>
      %c0_11 = arith.constant 0 : index
      %c0_12 = arith.constant 0 : index
      %13 = vector.load %arg4[%c0_11, %c0_12] : memref<1x128xf32, #tpu.memory_space<vmem>>, vector<1x128xf32>
      %14 = vector.broadcast %13 : vector<1x128xf32> to vector<8x128xf32>
      %15 = arith.addf %12, %14 : vector<8x128xf32>
      %cst_13 = arith.constant 0.000000e+00 : f32
      %16 = vector.broadcast %cst_13 : f32 to vector<8x128xf32>
      %17 = arith.maximumf %15, %16 : vector<8x128xf32>
      %c0_14 = arith.constant 0 : index
      %c0_15 = arith.constant 0 : index
      %18 = vector.load %arg5[%c0_14, %c0_15] : memref<8x128xf32, #tpu.memory_space<vmem>>, vector<8x128xf32>
      tpu.vector_store %arg5[%c0_14, %c0_15], %17 {strides = array<i32>} : memref<8x128xf32, #tpu.memory_space<vmem>>, vector<8x128xf32>,
    } else {
    }
    return
  }
  func.func @transform_0(%arg0: i32, %arg1: i32) -> (i32, i32) {
    %c0_i32 = arith.constant 0 : i32
    %c0_i32_0 = arith.constant 0 : i32
    return %c0_i32, %arg1 : i32, i32
  }
  func.func @transform_1(%arg0: i32, %arg1: i32) -> (i32, i32) {
    %c0_i32 = arith.constant 0 : i32
    return %arg1, %arg0 : i32, i32
  }
  func.func @transform_2(%arg0: i32, %arg1: i32) -> (i32, i32) {
    %c0_i32 = arith.constant 0 : i32
    %c0_i32_0 = arith.constant 0 : i32
    return %c0_i32, %arg0 : i32, i32
  }
  func.func @transform_3(%arg0: i32, %arg1: i32) -> (i32, i32) {
    %c0_i32 = arith.constant 0 : i32
    %c0_i32_0 = arith.constant 0 : i32
    return %c0_i32, %arg0 : i32, i32
  }
}

module attributes {stable_mosaic.version = 11 : i64} {
  func.func @_epilogue_kernel(%arg0: i32, %arg1: memref<8x128xf32, #tpu.memory_space<vmem>>, %arg2: memref<128x32xf32, #tpu.memory_space<vmem>>, %arg3: memref<1x32xf32, #tpu.memory_space<vmem>>, %arg4: memref<32x37xf32, #tpu.memory_space<vmem>>, %arg5: memref<1x37xf32, #tpu.memory_space<vmem>>, %arg6: memref<8x37xf32, #tpu.memory_space<vmem>>) attributes {dimension_semantics = [#tpu.dimension_semantics<arbitrary>], iteration_bounds = array<i64: 1>, scalar_prefetch = 0 : i64, scratch_operands = 0 : i64, tpu.core_type = #tpu.core_type<tc>, window_params = [{pipeline_mode = #tpu.pipeline_mode<synchronous>, transform_indices = @transform_0, window_bounds = array<i64: 8, 128>}, {pipeline_mode = #tpu.pipeline_mode<synchronous>, transform_indices = @transform_1, window_bounds = array<i64: 128, 32>}, {pipeline_mode = #tpu.pipeline_mode<synchronous>, transform_indices = @transform_2, window_bounds = array<i64: 1, 32>}, {pipeline_mode = #tpu.pipeline_mode<synchronous>, transform_indices = @transform_3, window_bounds = array<i64: 32, 37>}, {pipeline_mode = #tpu.pipeline_mode<synchronous>, transform_indices = @transform_4, window_bounds = array<i64: 1, 37>}, {pipeline_mode = #tpu.pipeline_mode<synchronous>, transform_indices = @transform_5, window_bounds = array<i64: 8, 37>}]} {
    %c0 = arith.constant 0 : index
    %c0_0 = arith.constant 0 : index
    %0 = vector.load %arg1[%c0, %c0_0] : memref<8x128xf32, #tpu.memory_space<vmem>>, vector<8x128xf32>
    %c0_1 = arith.constant 0 : index
    %c0_2 = arith.constant 0 : index
    %1 = vector.load %arg2[%c0_1, %c0_2] : memref<128x32xf32, #tpu.memory_space<vmem>>, vector<128x32xf32>
    %cst = arith.constant dense<0.000000e+00> : vector<8x32xf32>
    %2 = tpu.matmul %0, %1, %cst {dimension_numbers = #tpu.dot_dimension_numbers<[1], [0], [0], [1], [0, 0, 1, 1], [], []>} : vector<8x128xf32>, vector<128x32xf32>, vector<8x32xf32> -> vector<8x32xf32>
    %c0_3 = arith.constant 0 : index
    %c0_4 = arith.constant 0 : index
    %3 = vector.load %arg3[%c0_3, %c0_4] : memref<1x32xf32, #tpu.memory_space<vmem>>, vector<1x32xf32>
    %4 = vector.broadcast %3 : vector<1x32xf32> to vector<8x32xf32>
    %5 = arith.addf %2, %4 : vector<8x32xf32>
    %cst_5 = arith.constant 0.000000e+00 : f32
    %6 = vector.broadcast %cst_5 : f32 to vector<8x32xf32>
    %7 = arith.maximumf %5, %6 : vector<8x32xf32>
    %c0_6 = arith.constant 0 : index
    %c0_7 = arith.constant 0 : index
    %8 = vector.load %arg4[%c0_6, %c0_7] : memref<32x37xf32, #tpu.memory_space<vmem>>, vector<32x37xf32>
    %cst_8 = arith.constant dense<0.000000e+00> : vector<8x37xf32>
    %9 = tpu.matmul %7, %8, %cst_8 {dimension_numbers = #tpu.dot_dimension_numbers<[1], [0], [0], [1], [0, 0, 1, 1], [], []>} : vector<8x32xf32>, vector<32x37xf32>, vector<8x37xf32> -> vector<8x37xf32>
    %c0_9 = arith.constant 0 : index
    %c0_10 = arith.constant 0 : index
    %10 = vector.load %arg5[%c0_9, %c0_10] : memref<1x37xf32, #tpu.memory_space<vmem>>, vector<1x37xf32>
    %11 = vector.broadcast %10 : vector<1x37xf32> to vector<8x37xf32>
    %12 = arith.addf %9, %11 : vector<8x37xf32>
    %13 = arith.negf %12 : vector<8x37xf32>
    %14 = math.exp %13 : vector<8x37xf32>
    %cst_11 = arith.constant 1.000000e+00 : f32
    %15 = vector.broadcast %cst_11 : f32 to vector<8x37xf32>
    %16 = arith.addf %15, %14 : vector<8x37xf32>
    %17 = arith.divf %15, %16 : vector<8x37xf32>
    %c0_12 = arith.constant 0 : index
    %c0_13 = arith.constant 0 : index
    %18 = vector.load %arg6[%c0_12, %c0_13] : memref<8x37xf32, #tpu.memory_space<vmem>>, vector<8x37xf32>
    tpu.vector_store %arg6[%c0_12, %c0_13], %17 {strides = array<i32>} : memref<8x37xf32, #tpu.memory_space<vmem>>, vector<8x37xf32>,
    return
  }
  func.func @transform_0(%arg0: i32) -> (i32, i32) {
    %c0_i32 = arith.constant 0 : i32
    %c0_i32_0 = arith.constant 0 : i32
    %c0_i32_1 = arith.constant 0 : i32
    return %c0_i32, %c0_i32_0 : i32, i32
  }
  func.func @transform_1(%arg0: i32) -> (i32, i32) {
    %c0_i32 = arith.constant 0 : i32
    %c0_i32_0 = arith.constant 0 : i32
    %c0_i32_1 = arith.constant 0 : i32
    return %c0_i32, %c0_i32_0 : i32, i32
  }
  func.func @transform_2(%arg0: i32) -> (i32, i32) {
    %c0_i32 = arith.constant 0 : i32
    %c0_i32_0 = arith.constant 0 : i32
    %c0_i32_1 = arith.constant 0 : i32
    return %c0_i32, %c0_i32_0 : i32, i32
  }
  func.func @transform_3(%arg0: i32) -> (i32, i32) {
    %c0_i32 = arith.constant 0 : i32
    %c0_i32_0 = arith.constant 0 : i32
    %c0_i32_1 = arith.constant 0 : i32
    return %c0_i32, %c0_i32_0 : i32, i32
  }
  func.func @transform_4(%arg0: i32) -> (i32, i32) {
    %c0_i32 = arith.constant 0 : i32
    %c0_i32_0 = arith.constant 0 : i32
    %c0_i32_1 = arith.constant 0 : i32
    return %c0_i32, %c0_i32_0 : i32, i32
  }
  func.func @transform_5(%arg0: i32) -> (i32, i32) {
    %c0_i32 = arith.constant 0 : i32
    %c0_i32_0 = arith.constant 0 : i32
    %c0_i32_1 = arith.constant 0 : i32
    return %c0_i32, %c0_i32_0 : i32, i32
  }
}

</mosaic_0001>

<bundles_post_ra>
// kernel: multi_head_binary_forward.3
= control target key start
LH: loop header
LB: loop body
LE: loop exit
PB: predicated region body
PF: predicated region fallthrough
CT: control target
= control target key end

     0   :  { %v324_v1 = vmov 0.0   ;;  %vm325_vm0 = vmmov 0   ;;  %s429_s0 = inlined_call_operand.vmem [shape: f32[8,128], index: 0, kind: input, shape index: {}]   ;;  %s430_s1 = inlined_call_operand.vmem [shape: f32[128,32], index: 1, kind: input, shape index: {}]   ;;  %s431_s2 = inlined_call_operand.vmem [shape: f32[1,32], index: 2, kind: input, shape index: {}]   ;;  %s432_s3 = inlined_call_operand.vmem [shape: f32[32,37], index: 3, kind: input, shape index: {}]   ;;  %s433_s4 = inlined_call_operand.vmem [shape: f32[1,37], index: 4, kind: input, shape index: {}]   ;;  %s434_s5 = inlined_call_operand.hbm [shape: f32[8,37], index: 5, kind: output, shape index: {}]  }
   0x1   :  { %v37_v0 = vld [vmem:[%s430_s1 + $0x78] sm:$0xff]  ;;  %249 = vmatprep.subr.mxu0 %v324_v1  ;;  %v36_v2 = vld [vmem:[%s430_s1 + $0x70] sm:$0xff]  ;;  %281 = vmatprep.mubr.msk.f32.mxu0 %vm325_vm0, %v324_v1  ;;  %v35_v3 = vld [vmem:[%s430_s1 + $0x68] sm:$0xff] }
   0x2   :  { %250 = vmatpush3.msra.mxu0 %v37_v0  ;;  %284 = vmatprep.subr.mxu1 %v324_v1  ;;  %v34_v4 = vld [vmem:[%s430_s1 + $0x60] sm:$0xff]  ;;  %v119_v5 = vld [vmem:[%s432_s3 + $0x18] sm:$0xff] }
   0x3   :  { %251 = vmatprep.subr.mxu0 %v324_v1  ;;  %292 = vmatprep.mubr.msk.f32.mxu1 %vm325_vm0, %v324_v1 }
   0x4   :  { %252 = vmatpush3.msra.mxu0 %v36_v2  ;;  %285 = vmatpush3.msra.mxu1 %v119_v5 }
   0x5   :  { %253 = vmatprep.subr.mxu0 %v324_v1 }
   0x6   :  { %254 = vmatpush3.msra.mxu0 %v35_v3 }
   0x7   :  { %10 = vsyncpa [#allocation3], 0  ;;  %255 = vmatprep.subr.mxu0 %v324_v1  ;;  %v33_v6 = vld [vmem:[%s430_s1 + $0x58] sm:$0xff]  ;;  %286 = vmatprep.subr.mxu1 %v324_v1  ;;  %v32_v7 = vld [vmem:[%s430_s1 + $0x50] sm:$0xff]  ;;  %vm127_vm1 = vcmask 261120   ;;  %vm207_vm2 = vcmask 302080  }
   0x8   :  { %256 = vmatpush3.msra.mxu0 %v34_v4  ;;  %v31_v8 = vld [vmem:[%s430_s1 + $0x48] sm:$0xff]  ;;  %v30_v9 = vld [vmem:[%s430_s1 + $0x40] sm:$0xff]  ;;  %v29_v10 = vld [vmem:[%s430_s1 + $0x38] sm:$0xff] }
   0x9   :  { %257 = vmatprep.subr.mxu0 %v324_v1  ;;  %v28_v11 = vld [vmem:[%s430_s1 + $0x30] sm:$0xff]  ;;  %v27_v12 = vld [vmem:[%s430_s1 + $0x28] sm:$0xff]  ;;  %v26_v13 = vld [vmem:[%s430_s1 + $0x20] sm:$0xff] }
   0xa   :  { %258 = vmatpush3.msra.mxu0 %v33_v6  ;;  %v25_v14 = vld [vmem:[%s430_s1 + $0x18] sm:$0xff]  ;;  %v24_v15 = vld [vmem:[%s430_s1 + $0x10] sm:$0xff]  ;;  %v23_v16 = vld [vmem:[%s430_s1 + $0x8] sm:$0xff] }
   0xb   :  { %259 = vmatprep.subr.mxu0 %v324_v1  ;;  %v22_v17 = vld [vmem:[%s430_s1] sm:$0xff]  ;;  %v118_v19 = vld [vmem:[%s432_s3 + $0x10] sm:$0xff]  ;;  %v117_v20 = vld [vmem:[%s432_s3 + $0x8] sm:$0xff] }
   0xc   :  { %260 = vmatpush3.msra.mxu0 %v32_v7  ;;  %v21_v18 = vld [vmem:[%s429_s0] sm:$0xff]  ;;  %287 = vmatpush3.msra.mxu1 %v118_v19 }
   0xd   :  { %261 = vmatprep.subr.mxu0 %v324_v1  ;;  %288 = vmatprep.subr.mxu1 %v324_v1  ;;  %v116_v21 = vld [vmem:[%s432_s3] sm:$0xff]  ;;  %s326_s3 = smov [#allocation2]  }
   0xe   :  { %262 = vmatpush3.msra.mxu0 %v31_v8  ;;  %289 = vmatpush3.msra.mxu1 %v117_v20  ;;  %v223_v22 = vld [vmem:[%s431_s2] ss:$0 sm:$0xff]  ;;  %s215_s2 = sshll.u32 %s326_s3, 4  ;;  %s216_s2 = int_to_ptr.vmem [resolvable:$true] %s215_s2 }
   0xf   :  { %263 = vmatprep.subr.mxu0 %v324_v1  ;;  %290 = vmatprep.subr.mxu1 %v324_v1  ;;  %v224_v27 = vld [vmem:[%s433_s4] ss:$0 sm:$0xff]  ;;  %s302_s12 = scalar_lea.vmem %s216_s2, 128  ;;  %p307_p1 = scmp.lt.s32.totalorder %s216_s2, %s216_s2 }
  0x10   :  { %264 = vmatpush3.msra.mxu0 %v30_v9  ;;  %291 = vmatpush3.msra.mxu1 %v116_v21  ;;  %p303_p0 = scmp.ne.s32.totalorder %s216_s2, %s302_s12  ;;  %p308_p2 = scmp.lt.s32.totalorder %s302_s12, %s302_s12 }
  0x11   :  { %265 = vmatprep.subr.mxu0 %v324_v1 }
  0x12   :  { %266 = vmatpush3.msra.mxu0 %v29_v10  ;;  %p309_p3 = por %p308_p2, %p307_p1 }
  0x13   :  { %267 = vmatprep.subr.mxu0 %v324_v1 }
  0x14   :  { %268 = vmatpush3.msra.mxu0 %v28_v11  ;;  %p310_p4 = pnand %p309_p3, %p303_p0 }
  0x15   :  { %269 = vmatprep.subr.mxu0 %v324_v1 }
  0x16   :  { %270 = vmatpush3.msra.mxu0 %v27_v12 }
  0x17   :  { %271 = vmatprep.subr.mxu0 %v324_v1 }
  0x18   :  { %272 = vmatpush3.msra.mxu0 %v26_v13 }
  0x19   :  { %273 = vmatprep.subr.mxu0 %v324_v1 }
  0x1a   :  { %274 = vmatpush3.msra.mxu0 %v25_v14 }
  0x1b   :  { %275 = vmatprep.subr.mxu0 %v324_v1 }
  0x1c   :  { %276 = vmatpush3.msra.mxu0 %v24_v15 }
  0x1d   :  { %277 = vmatprep.subr.mxu0 %v324_v1 }
  0x1e   :  { %278 = vmatpush3.msra.mxu0 %v23_v16 }
  0x1f   :  { %279 = vmatprep.subr.mxu0 %v324_v1 }
  0x20   :  { %280 = vmatpush3.msra.mxu0 %v22_v17 }
  0x21   :  { %282 = vmatmul.mubr.f32.vlgmr.msra.gmra.mxu0 %v21_v18 }
  0xe1   :  { %v111_v23 = vpop.f32.mrf.mxu0 }
  0xe2   :  { %v112_v24 = vadd.f32 %v223_v22, %v111_v23 }
  0xe3   :  { %v283_v25 = vpop.f32.mrf.mxu0 }
  0xe4   :  { %v115_v26 = vmax.f32 %v112_v24, 0.0 }
  0xe6   :  { %293 = vmatmul.mubr.msk.f32.vlgmr.msra.gmra.mxu1 %vm127_vm1, %v115_v26 }
 0x1a6   :  { %v197_v28 = vpop.f32.mrf.mxu1 }
 0x1a7   :  { %v198_v29 = vadd.f32 %v224_v27, %v197_v28 }
 0x1a8   :  { %v294_v30 = vpop.f32.mrf.mxu1 }
 0x1a9   :  { %v226_v31 = vmul.f32 -1.442695, %v198_v29 }
 0x1ab   :  { %298 = vpow2.f32 %v226_v31 }
 0x1b8   :  { %v299_v32 = vpop.eup %298 }
 0x1b9   :  { %v204_v33 = vadd.f32 1.0, %v299_v32 }
 0x1bb   :  { %300 = vrcp.f32 %v204_v33 }
 0x1c8   :  { %v301_v34 = vpop.eup %300 }
 0x1c9   :  { %208 = vst.msk [vmem:[#allocation2] sm:$0xff] %vm207_vm2, %v301_v34 }
 0x1ca   :  { %313 = shalt.err (!%p310_p4)
}
 0x1cb   :  { %218 = dma.vmem_to_hbm [thread:$0]  %s216_s2, 128, %s434_s5, [#allocation3]  }
 0x1cc   :  { %322 = dma.done.wait [#allocation3], 128  }
 0x1cd   :  { %323 = vsyncadd [#allocation3], 4294967168 }
 0x1ce   :  { %222 = vsyncpa [#allocation3], 1 }

// kernel: multi_head_binary_forward.2
= control target key start
LH: loop header
LB: loop body
LE: loop exit
PB: predicated region body
PF: predicated region fallthrough
CT: control target
= control target key end

     0   :  { %8 = vsyncpa [#allocation4], 0  ;;  %s806_s0 = inlined_call_operand.vmem [shape: bf16[8,256], index: 0, kind: input, shape index: {}]   ;;  %s807_s1 = inlined_call_operand.hbm [shape: bf16[256,128], index: 1, kind: input, shape index: {}]   ;;  %s808_s2 = inlined_call_operand.vmem [shape: f32[1,128], index: 2, kind: input, shape index: {}]   ;;  %s809_s3 = inlined_call_operand.vmem [shape: f32[8,128], index: 3, kind: output, shape index: {}]  }
   0x1   :  { %10 = vsyncpa [#allocation4 + $0x1], 0  ;;  %s689_s12 = smov 0   ;;  %s691_s13 = smov 0  }
   0x2   :  { %s693_s14 = smov 0   ;;  %s695_s15 = smov 0  }
   0x3   :  { %s697_s16 = smov 0   ;;  %s699_s17 = smov 0  }
   0x4 LB: > { %s461_s18 = sadd.s32 4294967295, %s661_s17   ;;  %s25_s19 = sadd.s32 1, %s657_s16  ;;  %s661_s17 = sphi %s699_s17, %s16_s17   ;;  %s657_s16 = sphi %s697_s16, %s817_s16   ;;  %s653_s15 = sphi %s695_s15, %s816_s15   ;;  %s649_s14 = sphi %s693_s14, %s815_s14   ;;  %s645_s13 = sphi %s691_s13, %s814_s13   ;;  %s641_s12 = sphi %s689_s12, %s813_s12  }
   0x5   : > { %p26_p0 = scmp.ge.s32.totalorder %s25_s19, 2  ;;  %s63_s20 = sadd.s32 1, %s649_s14 }
   0x6   : > { %p70_p1 = scmp.ne.s32.totalorder %s649_s14, %s645_s13  ;;  %p71_p2 = scmp.eq.s32.totalorder %s661_s17, 0 }
   0x7   : > { %s819_s19 = smov (%p26_p0, %s25_s19), 0  ;;  %p76_p4 = scmp.ne.s32.totalorder %s645_s13, %s641_s12 }
   0x8   : > { %p725_p3 = por %p71_p2, %p70_p1  ;;  %s58_s22 = ssub.s32 %s657_s16, %s819_s19 }
   0x9   : > { %p77_p5 = scmp.eq.s32.totalorder %s461_s18, 0  ;;  %p61_p6 = scmp.eq.s32.totalorder %s58_s22, 0 }
   0xa   : > { %p521_p8 = scmp.lt.s32.totalorder %s661_s17, 2  ;;  %s165_s25 = sand.u32 1, %s649_s14  }
   0xb   : > { %p732_p7 = por %p77_p5, %p76_p4  ;;  %s485_s26 = sshll.u32 %s657_s16, 10 }
   0xc   : > { %s738_s24 = scalar_select %p61_p6, %s649_s14, %s63_s20  }
   0xd   : > { %s465_s27 = sshll.u32 %s165_s25, 6  ;;  %s176_s30 = scalar_lea.hbm %s807_s1, %s485_s26 }
   0xe   : > { %s169_s4 = scalar_lea.vmem [#allocation3], %s465_s27  ;;  %p747_p9 = pnand %p521_p8, %p725_p3 }
   0xf   : > { %s177_s5 = sshll.u32 %s169_s4, 4  ;;  %s166_s7 = scalar_lea.sflag [#allocation4], %s165_s25  ;;  %s178_s5 = int_to_ptr.vmem [resolvable:$true] %s177_s5 }
  0x10   : > { %p585_p10 = pneg %p747_p9  ;;  %s596_s8 = scalar_lea.vmem %s178_s5, 1024 }
  0x11   : > { %p597_p11 = scmp.ne.s32.totalorder %s178_s5, %s596_s8  ;;  %s663_s9 = smov [#allocation3]  }
  0x12   : > { %s601_s10 = sshll.u32 %s663_s9, 4  ;;  %s602_s10 = int_to_ptr.vmem [resolvable:$false] %s601_s10 }
  0x13   : > { %p599_p12 = pnand %p597_p11, %p585_p10  ;;  %s603_s11 = scalar_lea.vmem %s602_s10, 2048 }
  0x14   : > { %p604_p0 = scmp.lt.s32.totalorder %s178_s5, %s602_s10  ;;  %p605_p1 = scmp.lt.s32.totalorder %s603_s11, %s596_s8 }
  0x15   : > { %p600_p13 = pneg %p599_p12 }
  0x16   : > { %p606_p2 = por %p605_p1, %p604_p0 }
  0x18   : > { %p607_p3 = pnand %p606_p2, %p600_p13 }
  0x1a   : > { %610 = shalt.err (!%p607_p3)
}
  0x1b   : > { %s664_s12 = smov 64   ;;  %s665_s18 = smov 4  }
  0x1c   : > { %520 = dma.hbm_to_vmem [thread:$0]  (!%p747_p9), %s176_s30, 1024, %s178_s5, %s166_s7, %s664_s12, %s664_s12, %s665_s18  }
  0x1d   : > { %p468_p4 = scmp.ge.s32.totalorder %s661_s17, 1  ;;  %p185_p5 = scmp.lt.s32.totalorder %s661_s17, 3 }
  0x1f   : > { %p186_p6 = pnand %p468_p4, %p185_p5 }
  0x20   : > { %s191_s20 = sand.u32 (!%p186_p6), 1, %s645_s13  }
  0x21   : > { %189 = sbr.rel (%p186_p6) target bundleno = 290 (0x122), region = 32  ;;  %s469_s21 = sshll.u32 (!%p186_p6), %s191_s20, 6 }
  0x22   : > { %s192_s22 = scalar_lea.sflag (!%p186_p6), [#allocation4], %s191_s20  ;;  %s758_s25 = scalar_lea.vmem (!%p186_p6), [#allocation3], %s469_s21 }
  0x26   : > { %636 = dma.done.wait (%p732_p7), %s192_s22, 1024  }
  0x27   : > { %638 = vsyncadd (%p732_p7), %s192_s22, 4294966272  ;;  %p224_p8 = scmp.lt.s32.totalorder %s653_s15, 1  ;;  %p471_p9 = scmp.ne.s32.totalorder %s653_s15, 0 }
  0x29   : > { %s225_s26 = scalar_select %p224_p8, %s653_s15, 1 }
  0x2a   : > { %240 = sbr.rel (%p471_p9) target bundleno = 49 (0x31), region = 40 }
  0x2b   : > { %s470_s27 = sshll.u32 %s225_s26, 2 }
  0x2c   : > { %s769_s30 = scalar_lea.vmem %s806_s0, %s470_s27 }
  0x2f   : > { %v666_v0 = vmov 0.0  }
  0x30   : > { %241 = vst [vmem:[#allocation2] sm:$0xff] %v666_v0 }
  0x31 PF: > { %v575_v1 = vld [vmem:[%s758_s25 + $0x38] sm:$0xff]   ;;  %v667_v2 = vmov 0.0   ;;  %v576_v3 = vld [vmem:[%s758_s25 + $0x30] sm:$0xff]   ;;  %vm668_vm0 = vmmov 0   ;;  %v577_v4 = vld [vmem:[%s758_s25 + $0x28] sm:$0xff]   ;;  %p480_p7 = scmp.ne.s32.totalorder %s653_s15, 1 }
  0x32   : > { %495 = vmatprep.subr.bf16.mxu0 %v667_v2  ;;  %511 = vmatprep.mubr.msk.bf16.mxu0 %vm668_vm0, %v667_v2  ;;  %v578_v5 = vld [vmem:[%s758_s25 + $0x20] sm:$0xff]   ;;  %v579_v6 = vld [vmem:[%s758_s25 + $0x18] sm:$0xff]   ;;  %v580_v7 = vld [vmem:[%s758_s25 + $0x10] sm:$0xff]  }
  0x33   : > { %496 = vmatpush3.bf16.msra.mxu0 %v575_v1  ;;  %v581_v8 = vld [vmem:[%s758_s25 + $0x8] sm:$0xff]   ;;  %v582_v9 = vld [vmem:[%s758_s25] sm:$0xff]   ;;  %v243_v10 = vld [vmem:[%s769_s30] sm:$0xf] }
  0x34   : > { %497 = vmatprep.subr.bf16.mxu0 %v667_v2 }
  0x37   : > { %498 = vmatpush3.bf16.msra.mxu0 %v576_v3  ;;  %v242_v11 = vld [vmem:[#allocation2] sm:$0xff] }
  0x38   : > { %499 = vmatprep.subr.bf16.mxu0 %v667_v2 }
  0x3b   : > { %500 = vmatpush3.bf16.msra.mxu0 %v577_v4 }
  0x3c   : > { %501 = vmatprep.subr.bf16.mxu0 %v667_v2 }
  0x3f   : > { %502 = vmatpush3.bf16.msra.mxu0 %v578_v5 }
  0x40   : > { %503 = vmatprep.subr.bf16.mxu0 %v667_v2 }
  0x43   : > { %504 = vmatpush3.bf16.msra.mxu0 %v579_v6 }
  0x44   : > { %505 = vmatprep.subr.bf16.mxu0 %v667_v2 }
  0x47   : > { %506 = vmatpush3.bf16.msra.mxu0 %v580_v7 }
  0x48   : > { %507 = vmatprep.subr.bf16.mxu0 %v667_v2 }
  0x4b   : > { %508 = vmatpush3.bf16.msra.mxu0 %v581_v8 }
  0x4c   : > { %509 = vmatprep.subr.bf16.mxu0 %v667_v2 }
  0x4f   : > { %510 = vmatpush3.bf16.msra.mxu0 %v582_v9 }
  0x52   : > { %512 = vmatmul.mubr.bf16.vlgmr.msra.gmra.mxu0 %v243_v10 }
 0x112   : > { %v342_v12 = vpop.f32.mrf.mxu0 }
 0x113   : > { %v348_v13 = vadd.f32 %v342_v12, %v242_v11 }
 0x114   : > { %v513_v14 = vpop.f32.mrf.mxu0  ;;  %353 = sbr.rel (%p480_p7) target bundleno = 290 (0x122), region = 44 }
 0x115   : > { %349 = vst [vmem:[#allocation2] sm:$0xff] %v348_v13 }
 0x116   : > { %v345_v15 = vpop.f32.mrf.mxu0 }
 0x118   : > { %v514_v16 = vpop.f32.mrf.mxu0 }
 0x119   : > { %v481_v18 = vld [vmem:[%s808_s2] ss:$0 sm:$0xff] }
 0x11c   : > { %v354_v17 = vld [vmem:[#allocation2] sm:$0xff] }
 0x11d   : > { %v362_v19 = vadd.f32 %v481_v18, %v354_v17 }
 0x11f   : > { %v363_v20 = vmax.f32 %v362_v19, 0.0 }
 0x121   : > { %364 = vst [vmem:[%s809_s3] sm:$0xff] %v363_v20 }
 0x122 PF: > { %s16_s17 = sadd.s32 1, %s661_s17   ;;  %s813_s12 = smov %s645_s13 }
 0x123   : > { %p13_p10 = scmp.ge.s32.totalorder %s16_s17, 4   ;;  %s814_s13 = smov %s649_s14 }
 0x124   : > { %s815_s14 = smov %s738_s24  ;;  %s816_s15 = smov %s657_s16 }
 0x125   : > { %s817_s16 = smov %s819_s19  ;;  %15 = sbr.rel (!%p13_p10) target bundleno = 4 (0x4), region = 86 }
 0x12a   :  { %384 = vsyncpa [#allocation4], 1 }
 0x12b   :  { %386 = vsyncpa [#allocation4 + $0x1], 1 }

</bundles_post_ra>
